<compile_context>
chip_gen: v5e
topology: v5e:2x2
jax: 0.10.0
libtpu: 0.0.40
codegen_flags: <defaults>
</compile_context>

<pallas_src>
import functools
import math

import jax
import jax.numpy as jnp
from jax.experimental import pallas as pl
from jax.experimental.pallas import tpu as pltpu

_LANE = 128     # lane width  (last-dim tiling).  Use 256 on v6e/v7x if hidden>=256.
_SUBLANE = 8    # f32 sublane width (second-to-last dim tiling)
_VMEM = pltpu.MemorySpace.VMEM


def _round_up(x, m):
    return ((x + m - 1) // m) * m


def _apply_act(y, act):
    if act == "relu":
        return jnp.maximum(y, 0.0)
    if act == "tanh":
        return jnp.tanh(y)
    if act == "sigmoid":
        return jax.nn.sigmoid(y)
    if act == "identity":
        return y
    raise NotImplementedError(
        f"Activation {act} not implemented. "
        "Possible choice: ['tanh', 'sigmoid', 'relu', 'identity'].")


# ---------------------------------------------------------------------------
# Pallas kernel: whole MLP fused + masked softmax / log-softmax epilogue.
# refs = (x, w0, b0, ..., wN, bN, logits, probs, logp [, x_stage])
# ---------------------------------------------------------------------------
def _fused_policy_kernel(*refs, acts, d_in, out_dim, stage_input):
    n_layers = len(acts)
    x_ref = refs[0]
    param_refs = refs[1:1 + 2 * n_layers]
    logits_ref, probs_ref, logp_ref = refs[1 + 2 * n_layers:4 + 2 * n_layers]

    if stage_input:
        # Zero-fill the staging slab explicitly (padded lanes must not hold
        # stale NaN/Inf), then drop the real-width input into the low lanes.
        x_stage = refs[4 + 2 * n_layers]
        x_stage[...] = jnp.zeros_like(x_stage)
        x_stage[:, 0:d_in] = x_ref[...].astype(x_stage.dtype)
        h = x_stage[...]
    else:
        h = x_ref[...].astype(jnp.float32)

    for i, act in enumerate(acts):                      # unrolled at trace time
        w = param_refs[2 * i][...]                      # (Di_pad, Di+1_pad)
        b_full = param_refs[2 * i + 1][...]             # (8, Di+1_pad) unmasked load
        b = b_full[0:1, :]                              # row-0 view -> broadcast add
        h = jnp.dot(h, w, preferred_element_type=jnp.float32) + b
        h = _apply_act(h, act)

    # ---- fused distribution head: softmax / log-softmax over real lanes ----
    lane = jax.lax.broadcasted_iota(jnp.int32, h.shape, 1)
    l_m = jnp.where(lane < out_dim, h, jnp.float32(-1e30))
    m = jnp.max(l_m, axis=-1, keepdims=True)
    e = jnp.exp(l_m - m)                                # EUP
    s = jnp.sum(e, axis=-1, keepdims=True)              # XLU
    probs = e / s
    logp = (l_m - m) - jnp.log(s)                       # EUP

    logits_ref[...] = h[:, 0:out_dim].astype(logits_ref.dtype)
    probs_ref[...] = probs[:, 0:out_dim].astype(probs_ref.dtype)
    logp_ref[...] = logp[:, 0:out_dim].astype(logp_ref.dtype)


# ---------------------------------------------------------------------------
# One-time (init-path) parameter padding into (8,128)-aligned VMEM slabs.
# ---------------------------------------------------------------------------
def pad_policy_params(params):
    dims = [params[0][0].shape[0]] + [w.shape[1] for (w, _) in params]
    dims_pad = [_round_up(d, _LANE) for d in dims]
    slabs = []
    for i, (w, b) in enumerate(params):
        din, dout = w.shape
        w_p = jnp.zeros((dims_pad[i], dims_pad[i + 1]), jnp.float32)
        w_p = w_p.at[:din, :dout].set(w.astype(jnp.float32))
        # bias replicated across all 8 sublanes -> unmasked in-kernel load
        b_p = jnp.zeros((_SUBLANE, dims_pad[i + 1]), jnp.float32)
        b_p = b_p.at[:, :dout].set(
            jnp.broadcast_to(b.reshape(1, -1).astype(jnp.float32),
                             (_SUBLANE, dout)))
        slabs.extend([w_p, b_p])
    meta = {"dims": tuple(dims), "dims_pad": tuple(dims_pad),
            "n_layers": len(params)}
    return tuple(slabs), meta


# ---------------------------------------------------------------------------
# Fused forward: logits, probs, log_probs — one pallas_call.
# ---------------------------------------------------------------------------
def categorical_policy_forward(x, padded_params, meta,
                               act_fn="relu", out_act_fn="identity",
                               max_batch_tile=1024):
    B, D = x.shape
    dims, dims_pad = meta["dims"], meta["dims_pad"]
    n_layers = meta["n_layers"]
    assert D == dims[0], f"input dim {D} != network input dim {dims[0]}"
    out_dim = dims[-1]
    d0_pad = dims_pad[0]
    acts = tuple(act_fn if i < n_layers - 1 else out_act_fn
                 for i in range(n_layers))

    # --- batch tiling ------------------------------------------------------
    TB = min(max_batch_tile, _round_up(B, _SUBLANE))
    # v7x: ensure >=2 grid steps (when the batch permits) so the "parallel"
    # batch axis can shard across both TensorCores.
    if B >= 2 * _SUBLANE and _round_up(B, TB) // TB < 2:
        TB = _round_up((B + 1) // 2, _SUBLANE)
    B_pad = _round_up(B, TB)

    x_p = x if B_pad == B else jnp.zeros((B_pad, D), x.dtype).at[:B].set(x)

    stage_input = (D != d0_pad)

    # --- BlockSpecs: x/outputs tiled over batch, params resident ------------
    in_specs = [pl.BlockSpec((TB, D), lambda i: (i, 0), memory_space=_VMEM)]
    for li in range(n_layers):
        in_specs.append(pl.BlockSpec((dims_pad[li], dims_pad[li + 1]),
                                     lambda i: (0, 0), memory_space=_VMEM))
        in_specs.append(pl.BlockSpec((_SUBLANE, dims_pad[li + 1]),
                                     lambda i: (0, 0), memory_space=_VMEM))

    out_shape = tuple(jax.ShapeDtypeStruct((B_pad, out_dim), jnp.float32)
                      for _ in range(3))
    out_specs = tuple(pl.BlockSpec((TB, out_dim), lambda i: (i, 0),
                                   memory_space=_VMEM) for _ in range(3))

    scratch_shapes = ([pltpu.VMEM((TB, d0_pad), jnp.float32)]
                      if stage_input else [])

    # --- VMEM budget (explicit limit, headroom included) --------------------
    param_bytes = sum(4 * (dims_pad[li] * dims_pad[li + 1]
                           + _SUBLANE * dims_pad[li + 1])
                      for li in range(n_layers))
    max_pad = max(dims_pad)
    vmem_bytes = (2 * param_bytes                      # (double-buffered) residents
                  + 2 * TB * D * 4                     # input blocks
                  + 2 * 3 * TB * _LANE * 4             # output blocks (lane-padded)
                  + (TB * d0_pad * 4 if stage_input else 0)
                  + 6 * TB * max_pad * 4)              # live intermediates
    vmem_limit = int(min(60 * 1024 * 1024, max(vmem_bytes, 4 * 1024 * 1024)))

    # --- advisory cost estimate ---------------------------------------------
    flops = sum(2 * B_pad * dims_pad[li] * dims_pad[li + 1]
                for li in range(n_layers))
    transcendentals = (B_pad * dims_pad[-1] + B_pad
                       + sum(B_pad * dims_pad[li + 1]
                             for li, a in enumerate(acts)
                             if a in ("tanh", "sigmoid")))
    bytes_accessed = (4 * B_pad * D + param_bytes + 3 * 4 * B_pad * out_dim)

    kernel = functools.partial(_fused_policy_kernel, acts=acts, d_in=D,
                               out_dim=out_dim, stage_input=stage_input)

    logits_p, probs_p, logp_p = pl.pallas_call(
        kernel,
        out_shape=out_shape,
        grid=(B_pad // TB,),
        in_specs=in_specs,
        out_specs=out_specs,
        scratch_shapes=scratch_shapes,
        compiler_params=pltpu.CompilerParams(
            dimension_semantics=("parallel",),
            vmem_limit_bytes=vmem_limit),
        cost_estimate=pl.CostEstimate(flops=flops,
                                      transcendentals=transcendentals,
                                      bytes_accessed=bytes_accessed),
    )(x_p, *padded_params)

    return logits_p[:B], probs_p[:B], logp_p[:B]


# ---------------------------------------------------------------------------
# Parameter init (torch.nn.Linear default: U(-1/sqrt(fan_in), 1/sqrt(fan_in)))
# ---------------------------------------------------------------------------
def init_policy_params(key, input_dim, action_dim, hidden_dims):
    if isinstance(hidden_dims, int):
        hidden_dims = [hidden_dims]
    dims = [input_dim] + list(hidden_dims) + [action_dim]
    params = []
    for i in range(len(dims) - 1):
        key, kw, kb = jax.random.split(key, 3)
        fan_in, fan_out = dims[i], dims[i + 1]
        bound = 1.0 / math.sqrt(fan_in)
        # Stored as (in_dim, out_dim): torch weight (out,in) pre-transposed.
        W = jax.random.uniform(kw, (fan_in, fan_out), jnp.float32, -bound, bound)
        b = jax.random.uniform(kb, (1, fan_out), jnp.float32, -bound, bound)
        params.append((W, b))
    return params


# ---------------------------------------------------------------------------
# Sampling head (plain-JAX glue; softmax/log_softmax already fused in-kernel).
# ---------------------------------------------------------------------------
def policy_sample(key, logits, probs, log_probs, deterministic=False):
    if deterministic:
        action = jnp.argmax(probs, axis=-1, keepdims=True)
        log_prob = jnp.log(jnp.max(probs, axis=-1, keepdims=True) + 1e-6)
    else:
        action = jax.random.categorical(key, logits, axis=-1)
        log_prob = jnp.take_along_axis(log_probs, action[:, None], axis=-1)
        action = action[:, None]
    return {"logit": logits, "probs": probs, "action": action,
            "log_prob": log_prob}


# ---------------------------------------------------------------------------
# Pure-JAX reference
# ---------------------------------------------------------------------------
def mlp_forward_ref(x, params, act_fn="relu", out_act_fn="identity"):
    n_layers = len(params)
    for i, (W, b) in enumerate(params):
        act = act_fn if i < n_layers - 1 else out_act_fn
        x = _apply_act(x @ W + b, act)
    return x


if __name__ == "__main__":
    key = jax.random.PRNGKey(0)
    key, kx, kp, ks = jax.random.split(key, 4)

    # CategoricalPolicyNetwork(input_dim=4, action_space=Discrete(3),
    #                          hidden_dims=[32, 32], act_fn='relu',
    #                          out_act_fn='identity')
    batch, input_dim, action_dim = 2, 4, 3
    hidden_dims = [32, 32]

    x = jax.random.normal(kx, (batch, input_dim), dtype=jnp.float32)
    params = init_policy_params(kp, input_dim, action_dim, hidden_dims)

    # Param padding hoisted to init (done ONCE, not per forward call).
    padded_params, meta = pad_policy_params(params)

    logits, probs, log_probs = categorical_policy_forward(
        x, padded_params, meta, act_fn="relu", out_act_fn="identity")
    logits = jax.block_until_ready(logits)

    ref_logits = mlp_forward_ref(x, params, act_fn="relu", out_act_fn="identity")
    assert logits.shape == (batch, action_dim)
    assert jnp.allclose(logits, ref_logits, atol=1e-5, rtol=1e-5)
    assert jnp.allclose(probs, jax.nn.softmax(ref_logits, axis=-1),
                        atol=1e-5, rtol=1e-4)
    assert jnp.allclose(log_probs, jax.nn.log_softmax(ref_logits, axis=-1),
                        atol=1e-5, rtol=1e-4)

    # sampling head (plain JAX) — sanity-check shapes only
    out = policy_sample(ks, logits, probs, log_probs, deterministic=False)
    out = jax.block_until_ready(out)
    assert out["action"].shape == (batch, 1)
    assert out["log_prob"].shape == (batch, 1)
    assert out["probs"].shape == (batch, action_dim)

    out_det = policy_sample(ks, logits, probs, log_probs, deterministic=True)
    assert out_det["action"].shape == (batch, 1)

    print("KERNEL_OK")
</pallas_src>

<mosaic_0001>
module attributes {stable_mosaic.version = 11 : i64} {
  func.func @_fused_policy_kernel(%arg0: i32, %arg1: memref<8x4xf32, #tpu.memory_space<vmem>>, %arg2: memref<128x128xf32, #tpu.memory_space<vmem>>, %arg3: memref<8x128xf32, #tpu.memory_space<vmem>>, %arg4: memref<128x128xf32, #tpu.memory_space<vmem>>, %arg5: memref<8x128xf32, #tpu.memory_space<vmem>>, %arg6: memref<128x128xf32, #tpu.memory_space<vmem>>, %arg7: memref<8x128xf32, #tpu.memory_space<vmem>>, %arg8: memref<8x3xf32, #tpu.memory_space<vmem>>, %arg9: memref<8x3xf32, #tpu.memory_space<vmem>>, %arg10: memref<8x3xf32, #tpu.memory_space<vmem>>, %arg11: memref<8x128xf32, #tpu.memory_space<vmem>>) attributes {dimension_semantics = [#tpu.dimension_semantics<parallel>], iteration_bounds = array<i64: 1>, scalar_prefetch = 0 : i64, scratch_operands = 1 : i64, tpu.core_type = #tpu.core_type<tc>, window_params = [{transform_indices = @transform_0, window_bounds = array<i64: 8, 4>}, {pipeline_mode = #tpu.pipeline_mode<synchronous>, transform_indices = @transform_1, window_bounds = array<i64: 128, 128>}, {pipeline_mode = #tpu.pipeline_mode<synchronous>, transform_indices = @transform_2, window_bounds = array<i64: 8, 128>}, {pipeline_mode = #tpu.pipeline_mode<synchronous>, transform_indices = @transform_3, window_bounds = array<i64: 128, 128>}, {pipeline_mode = #tpu.pipeline_mode<synchronous>, transform_indices = @transform_4, window_bounds = array<i64: 8, 128>}, {pipeline_mode = #tpu.pipeline_mode<synchronous>, transform_indices = @transform_5, window_bounds = array<i64: 128, 128>}, {pipeline_mode = #tpu.pipeline_mode<synchronous>, transform_indices = @transform_6, window_bounds = array<i64: 8, 128>}, {transform_indices = @transform_7, window_bounds = array<i64: 8, 3>}, {transform_indices = @transform_8, window_bounds = array<i64: 8, 3>}, {transform_indices = @transform_9, window_bounds = array<i64: 8, 3>}]} {
    %cst = arith.constant 0.000000e+00 : f32
    %0 = vector.broadcast %cst : f32 to vector<8x128xf32>
    %c0 = arith.constant 0 : index
    %c0_0 = arith.constant 0 : index
    %1 = vector.load %arg11[%c0, %c0_0] : memref<8x128xf32, #tpu.memory_space<vmem>>, vector<8x128xf32>
    tpu.vector_store %arg11[%c0, %c0_0], %0 {strides = array<i32>} : memref<8x128xf32, #tpu.memory_space<vmem>>, vector<8x128xf32>,
    %c0_1 = arith.constant 0 : index
    %c0_2 = arith.constant 0 : index
    %2 = vector.load %arg1[%c0_1, %c0_2] : memref<8x4xf32, #tpu.memory_space<vmem>>, vector<8x4xf32>
    %c0_3 = arith.constant 0 : index
    %c0_4 = arith.constant 0 : index
    %3 = vector.load %arg11[%c0_3, %c0_4] : memref<8x128xf32, #tpu.memory_space<vmem>>, vector<8x4xf32>
    tpu.vector_store %arg11[%c0_3, %c0_4], %2 {strides = array<i32>} : memref<8x128xf32, #tpu.memory_space<vmem>>, vector<8x4xf32>,
    %c0_5 = arith.constant 0 : index
    %c0_6 = arith.constant 0 : index
    %4 = vector.load %arg11[%c0_5, %c0_6] : memref<8x128xf32, #tpu.memory_space<vmem>>, vector<8x128xf32>
    %c0_7 = arith.constant 0 : index
    %c0_8 = arith.constant 0 : index
    %5 = vector.load %arg2[%c0_7, %c0_8] : memref<128x128xf32, #tpu.memory_space<vmem>>, vector<128x128xf32>
    %c0_9 = arith.constant 0 : index
    %c0_10 = arith.constant 0 : index
    %6 = vector.load %arg3[%c0_9, %c0_10] : memref<8x128xf32, #tpu.memory_space<vmem>>, vector<8x128xf32>
    %7 = vector.extract_strided_slice %6 {offsets = [0, 0], sizes = [1, 128], strides = [1, 1]} : vector<8x128xf32> to vector<1x128xf32>
    %cst_11 = arith.constant dense<0.000000e+00> : vector<8x128xf32>
    %8 = tpu.matmul %4, %5, %cst_11 {dimension_numbers = #tpu.dot_dimension_numbers<[1], [0], [0], [1], [0, 0, 1, 1], [], []>} : vector<8x128xf32>, vector<128x128xf32>, vector<8x128xf32> -> vector<8x128xf32>
    %9 = vector.broadcast %7 : vector<1x128xf32> to vector<8x128xf32>
    %10 = arith.addf %8, %9 : vector<8x128xf32>
    %cst_12 = arith.constant 0.000000e+00 : f32
    %11 = vector.broadcast %cst_12 : f32 to vector<8x128xf32>
    %12 = arith.maximumf %10, %11 : vector<8x128xf32>
    %c0_13 = arith.constant 0 : index
    %c0_14 = arith.constant 0 : index
    %13 = vector.load %arg4[%c0_13, %c0_14] : memref<128x128xf32, #tpu.memory_space<vmem>>, vector<128x128xf32>
    %c0_15 = arith.constant 0 : index
    %c0_16 = arith.constant 0 : index
    %14 = vector.load %arg5[%c0_15, %c0_16] : memref<8x128xf32, #tpu.memory_space<vmem>>, vector<8x128xf32>
    %15 = vector.extract_strided_slice %14 {offsets = [0, 0], sizes = [1, 128], strides = [1, 1]} : vector<8x128xf32> to vector<1x128xf32>
    %cst_17 = arith.constant dense<0.000000e+00> : vector<8x128xf32>
    %16 = tpu.matmul %12, %13, %cst_17 {dimension_numbers = #tpu.dot_dimension_numbers<[1], [0], [0], [1], [0, 0, 1, 1], [], []>} : vector<8x128xf32>, vector<128x128xf32>, vector<8x128xf32> -> vector<8x128xf32>
    %17 = vector.broadcast %15 : vector<1x128xf32> to vector<8x128xf32>
    %18 = arith.addf %16, %17 : vector<8x128xf32>
    %cst_18 = arith.constant 0.000000e+00 : f32
    %19 = vector.broadcast %cst_18 : f32 to vector<8x128xf32>
    %20 = arith.maximumf %18, %19 : vector<8x128xf32>
    %c0_19 = arith.constant 0 : index
    %c0_20 = arith.constant 0 : index
    %21 = vector.load %arg6[%c0_19, %c0_20] : memref<128x128xf32, #tpu.memory_space<vmem>>, vector<128x128xf32>
    %c0_21 = arith.constant 0 : index
    %c0_22 = arith.constant 0 : index
    %22 = vector.load %arg7[%c0_21, %c0_22] : memref<8x128xf32, #tpu.memory_space<vmem>>, vector<8x128xf32>
    %23 = vector.extract_strided_slice %22 {offsets = [0, 0], sizes = [1, 128], strides = [1, 1]} : vector<8x128xf32> to vector<1x128xf32>
    %cst_23 = arith.constant dense<0.000000e+00> : vector<8x128xf32>
    %24 = tpu.matmul %20, %21, %cst_23 {dimension_numbers = #tpu.dot_dimension_numbers<[1], [0], [0], [1], [0, 0, 1, 1], [], []>} : vector<8x128xf32>, vector<128x128xf32>, vector<8x128xf32> -> vector<8x128xf32>
    %25 = vector.broadcast %23 : vector<1x128xf32> to vector<8x128xf32>
    %26 = arith.addf %24, %25 : vector<8x128xf32>
    %27 = tpu.iota {dimensions = array<i32: 1>} : vector<8x128xi32>
    %c3_i32 = arith.constant 3 : i32
    %28 = vector.broadcast %c3_i32 : i32 to vector<8x128xi32>
    %29 = arith.cmpi slt, %27, %28 : vector<8x128xi32>
    %cst_24 = arith.constant -1.000000e+30 : f32
    %30 = vector.broadcast %cst_24 : f32 to vector<8x128xf32>
    %31 = arith.select %29, %26, %30 : vector<8x128xi1>, vector<8x128xf32>
    %cst_25 = arith.constant dense<0xFF800000> : vector<8xf32>
    %32 = vector.multi_reduction <maximumf>, %31, %cst_25 [1] : vector<8x128xf32> to vector<8xf32>
    %33 = vector.shape_cast %32 : vector<8xf32> to vector<8x1xf32>
    %34 = vector.broadcast %33 : vector<8x1xf32> to vector<8x128xf32>
    %35 = arith.subf %31, %34 : vector<8x128xf32>
    %36 = math.exp %35 : vector<8x128xf32>
    %cst_26 = arith.constant dense<0.000000e+00> : vector<8xf32>
    %37 = vector.multi_reduction <add>, %36, %cst_26 [1] : vector<8x128xf32> to vector<8xf32>
    %38 = vector.shape_cast %37 : vector<8xf32> to vector<8x1xf32>
    %39 = vector.broadcast %38 : vector<8x1xf32> to vector<8x128xf32>
    %40 = arith.divf %36, %39 : vector<8x128xf32>
    %41 = vector.broadcast %33 : vector<8x1xf32> to vector<8x128xf32>
    %42 = arith.subf %31, %41 : vector<8x128xf32>
    %43 = math.log %38 : vector<8x1xf32>
    %44 = vector.broadcast %43 : vector<8x1xf32> to vector<8x128xf32>
    %45 = arith.subf %42, %44 : vector<8x128xf32>
    %46 = vector.extract_strided_slice %26 {offsets = [0, 0], sizes = [8, 3], strides = [1, 1]} : vector<8x128xf32> to vector<8x3xf32>
    %c0_27 = arith.constant 0 : index
    %c0_28 = arith.constant 0 : index
    %47 = vector.load %arg8[%c0_27, %c0_28] : memref<8x3xf32, #tpu.memory_space<vmem>>, vector<8x3xf32>
    tpu.vector_store %arg8[%c0_27, %c0_28], %46 {strides = array<i32>} : memref<8x3xf32, #tpu.memory_space<vmem>>, vector<8x3xf32>,
    %48 = vector.extract_strided_slice %40 {offsets = [0, 0], sizes = [8, 3], strides = [1, 1]} : vector<8x128xf32> to vector<8x3xf32>
    %c0_29 = arith.constant 0 : index
    %c0_30 = arith.constant 0 : index
    %49 = vector.load %arg9[%c0_29, %c0_30] : memref<8x3xf32, #tpu.memory_space<vmem>>, vector<8x3xf32>
    tpu.vector_store %arg9[%c0_29, %c0_30], %48 {strides = array<i32>} : memref<8x3xf32, #tpu.memory_space<vmem>>, vector<8x3xf32>,
    %50 = vector.extract_strided_slice %45 {offsets = [0, 0], sizes = [8, 3], strides = [1, 1]} : vector<8x128xf32> to vector<8x3xf32>
    %c0_31 = arith.constant 0 : index
    %c0_32 = arith.constant 0 : index
    %51 = vector.load %arg10[%c0_31, %c0_32] : memref<8x3xf32, #tpu.memory_space<vmem>>, vector<8x3xf32>
    tpu.vector_store %arg10[%c0_31, %c0_32], %50 {strides = array<i32>} : memref<8x3xf32, #tpu.memory_space<vmem>>, vector<8x3xf32>,
    return
  }
  func.func @transform_0(%arg0: i32) -> (i32, i32) {
    %c0_i32 = arith.constant 0 : i32
    %c0_i32_0 = arith.constant 0 : i32
    return %arg0, %c0_i32 : i32, i32
  }
  func.func @transform_1(%arg0: i32) -> (i32, i32) {
    %c0_i32 = arith.constant 0 : i32
    %c0_i32_0 = arith.constant 0 : i32
    %c0_i32_1 = arith.constant 0 : i32
    return %c0_i32, %c0_i32_0 : i32, i32
  }
  func.func @transform_2(%arg0: i32) -> (i32, i32) {
    %c0_i32 = arith.constant 0 : i32
    %c0_i32_0 = arith.constant 0 : i32
    %c0_i32_1 = arith.constant 0 : i32
    return %c0_i32, %c0_i32_0 : i32, i32
  }
  func.func @transform_3(%arg0: i32) -> (i32, i32) {
    %c0_i32 = arith.constant 0 : i32
    %c0_i32_0 = arith.constant 0 : i32
    %c0_i32_1 = arith.constant 0 : i32
    return %c0_i32, %c0_i32_0 : i32, i32
  }
  func.func @transform_4(%arg0: i32) -> (i32, i32) {
    %c0_i32 = arith.constant 0 : i32
    %c0_i32_0 = arith.constant 0 : i32
    %c0_i32_1 = arith.constant 0 : i32
    return %c0_i32, %c0_i32_0 : i32, i32
  }
  func.func @transform_5(%arg0: i32) -> (i32, i32) {
    %c0_i32 = arith.constant 0 : i32
    %c0_i32_0 = arith.constant 0 : i32
    %c0_i32_1 = arith.constant 0 : i32
    return %c0_i32, %c0_i32_0 : i32, i32
  }
  func.func @transform_6(%arg0: i32) -> (i32, i32) {
    %c0_i32 = arith.constant 0 : i32
    %c0_i32_0 = arith.constant 0 : i32
    %c0_i32_1 = arith.constant 0 : i32
    return %c0_i32, %c0_i32_0 : i32, i32
  }
  func.func @transform_7(%arg0: i32) -> (i32, i32) {
    %c0_i32 = arith.constant 0 : i32
    %c0_i32_0 = arith.constant 0 : i32
    return %arg0, %c0_i32 : i32, i32
  }
  func.func @transform_8(%arg0: i32) -> (i32, i32) {
    %c0_i32 = arith.constant 0 : i32
    %c0_i32_0 = arith.constant 0 : i32
    return %arg0, %c0_i32 : i32, i32
  }
  func.func @transform_9(%arg0: i32) -> (i32, i32) {
    %c0_i32 = arith.constant 0 : i32
    %c0_i32_0 = arith.constant 0 : i32
    return %arg0, %c0_i32 : i32, i32
  }
}

</mosaic_0001>

<bundles_post_ra>
// kernel: tpu_custom_call.1
= control target key start
LH: loop header
LB: loop body
LE: loop exit
PB: predicated region body
PF: predicated region fallthrough
CT: control target
= control target key end

     0   :  { %15 = vsyncpa [#allocation4], 0  ;;  %s464_s0 = inlined_call_operand.vmem [shape: f32[8,4], index: 0, kind: input, shape index: {}]   ;;  %s465_s1 = inlined_call_operand.hbm [shape: f32[128,128], index: 1, kind: input, shape index: {}]   ;;  %s466_s2 = inlined_call_operand.vmem [shape: f32[8,128], index: 2, kind: input, shape index: {}]   ;;  %s467_s3 = inlined_call_operand.hbm [shape: f32[128,128], index: 3, kind: input, shape index: {}]   ;;  %s468_s4 = inlined_call_operand.hbm [shape: f32[8,128], index: 4, kind: input, shape index: {}]   ;;  %s469_s5 = inlined_call_operand.hbm [shape: f32[128,128], index: 5, kind: input, shape index: {}]   ;;  %s470_s6 = inlined_call_operand.vmem [shape: f32[8,128], index: 6, kind: input, shape index: {}]   ;;  %s471_s7 = inlined_call_operand.vmem [shape: f32[8,3], index: 7, kind: output, shape index: {0}]   ;;  %s472_s8 = inlined_call_operand.vmem [shape: f32[8,3], index: 8, kind: output, shape index: {1}]   ;;  %s473_s9 = inlined_call_operand.vmem [shape: f32[8,3], index: 9, kind: output, shape index: {2}]  }
   0x1   :  { %16 = vsyncpa [#allocation6], 0 }
   0x2   :  { %17 = vsyncpa [#allocation9], 0  ;;  %s39_s11 = sshll.u32 %s467_s3, 4  ;;  %s374_s12 = smov [#allocation5]   ;;  %s40_s11 = int_to_ptr.hbm [resolvable:$true] %s39_s11 }
   0x3   :  { %s41_s13 = sshll.u32 %s374_s12, 4  ;;  %s24_s16 = sshll.u32 %s465_s1, 4  ;;  %s42_s13 = int_to_ptr.vmem [resolvable:$true] %s41_s13  ;;  %s25_s16 = int_to_ptr.hbm [resolvable:$true] %s24_s16 }
   0x4   :  { %s375_s17 = smov 128   ;;  %s376_s18 = smov 8  }
   0x5   :  { %47 = dma.hbm_to_vmem [thread:$0]  %s40_s11, 2048, %s42_s13, [#allocation6], %s375_s17, %s375_s17, %s376_s18  }
   0x6   :  { %s377_s19 = smov [#allocation3]   ;;  %s53_s23 = sshll.u32 %s468_s4, 4  ;;  %s54_s23 = int_to_ptr.hbm [resolvable:$true] %s53_s23 }
   0x7   :  { %s26_s20 = sshll.u32 %s377_s19, 4  ;;  %s63_s25 = sshll.u32 %s469_s5, 4  ;;  %s27_s20 = int_to_ptr.vmem [resolvable:$true] %s26_s20  ;;  %s64_s25 = int_to_ptr.hbm [resolvable:$true] %s63_s25 }
   0x8   :  { %32 = dma.hbm_to_vmem [thread:$0]  %s25_s16, 2048, %s27_s20, [#allocation4], %s375_s17, %s375_s17, %s376_s18  }
   0x9   :  { %s378_s26 = smov [#allocation7]   ;;  %s379_s1 = smov [#allocation8]  }
   0xa   :  { %s55_s27 = sshll.u32 %s378_s26, 4  ;;  %s65_s28 = sshll.u32 %s379_s1, 4  ;;  %s56_s27 = int_to_ptr.vmem [resolvable:$true] %s55_s27  ;;  %s66_s28 = int_to_ptr.vmem [resolvable:$true] %s65_s28 }
   0xb   :  { %58 = dma.hbm_to_vmem [thread:$0]  %s54_s23, 128, %s56_s27, [#allocation6]  }
   0xc   :  { %71 = dma.hbm_to_vmem [thread:$0]  %s64_s25, 2048, %s66_s28, [#allocation9], %s375_s17, %s375_s17, %s376_s18  }
   0xd   :  { %368 = dma.done.wait [#allocation4], 2048  }
   0xe   :  { %369 = vsyncadd [#allocation4], 4294965248 }
   0xf   :  { %370 = dma.done.wait [#allocation6], 2176  }
  0x10   :  { %371 = vsyncadd [#allocation6], 4294965120 }
  0x11   :  { %372 = dma.done.wait [#allocation9], 2048  }
  0x12   :  { %373 = vsyncadd [#allocation9], 4294965248  ;;  %v380_v0 = vmov 0.0   ;;  %v110_v1 = vld [vmem:[#allocation3 + $0x78] sm:$0xff]  ;;  %v109_v2 = vld [vmem:[#allocation3 + $0x70] sm:$0xff]  ;;  %vm92_vm0 = vcmask 31744   ;;  %v211_v61 = vlaneseq }
  0x13   :  { %90 = vst [vmem:[#allocation2] sm:$0xff] %v380_v0  ;;  %113 = vmatpush.msra.mxu0 %v110_v1  ;;  %v108_v3 = vld [vmem:[#allocation3 + $0x68] sm:$0xff]  ;;  %v107_v4 = vld [vmem:[#allocation3 + $0x60] sm:$0xff]  ;;  %v91_v5 = vld [vmem:[%s464_s0] sm:$0xff]  ;;  %vm240_vm1 = vcmask 23552  }
  0x14   :  { %v149_v6 = vld [vmem:[#allocation5 + $0x78] sm:$0xff]  ;;  %93 = vst.msk [vmem:[#allocation2] sm:$0xff] %vm92_vm0, %v91_v5  ;;  %v148_v8 = vld [vmem:[#allocation5 + $0x70] sm:$0xff]  ;;  %v147_v9 = vld [vmem:[#allocation5 + $0x68] sm:$0xff]  ;;  %v212_v63 = vand.u32 127, %v211_v61 }
  0x15   :  { %114 = vmatpush.msra.mxu0 %v109_v2  ;;  %v106_v7 = vld [vmem:[#allocation3 + $0x58] sm:$0xff]  ;;  %152 = vmatpush.msra.mxu1 %v149_v6  ;;  %v105_v10 = vld [vmem:[#allocation3 + $0x50] sm:$0xff]  ;;  %v146_v11 = vld [vmem:[#allocation5 + $0x60] sm:$0xff] }
  0x16   :  { %v104_v12 = vld [vmem:[#allocation3 + $0x48] sm:$0xff]  ;;  %v145_v13 = vld [vmem:[#allocation5 + $0x58] sm:$0xff]  ;;  %v103_v14 = vld [vmem:[#allocation3 + $0x40] sm:$0xff]  ;;  %vm213_vm2 = vcmp.lt.s32.totalorder %v212_v63, 3 }
  0x17   :  { %115 = vmatpush.msra.mxu0 %v108_v3  ;;  %153 = vmatpush.msra.mxu1 %v148_v8  ;;  %v144_v15 = vld [vmem:[#allocation5 + $0x50] sm:$0xff]  ;;  %v102_v16 = vld [vmem:[#allocation3 + $0x38] sm:$0xff]  ;;  %v143_v17 = vld [vmem:[#allocation5 + $0x48] sm:$0xff] }
  0x18   :  { %v101_v18 = vld [vmem:[#allocation3 + $0x30] sm:$0xff]  ;;  %v142_v19 = vld [vmem:[#allocation5 + $0x40] sm:$0xff]  ;;  %v100_v20 = vld [vmem:[#allocation3 + $0x28] sm:$0xff] }
  0x19   :  { %116 = vmatpush.msra.mxu0 %v107_v4  ;;  %154 = vmatpush.msra.mxu1 %v147_v9  ;;  %v141_v21 = vld [vmem:[#allocation5 + $0x38] sm:$0xff]  ;;  %v99_v22 = vld [vmem:[#allocation3 + $0x20] sm:$0xff]  ;;  %v140_v23 = vld [vmem:[#allocation5 + $0x30] sm:$0xff] }
  0x1a   :  { %v98_v24 = vld [vmem:[#allocation3 + $0x18] sm:$0xff]  ;;  %v139_v25 = vld [vmem:[#allocation5 + $0x28] sm:$0xff]  ;;  %v97_v26 = vld [vmem:[#allocation3 + $0x10] sm:$0xff] }
  0x1b   :  { %117 = vmatpush.msra.mxu0 %v106_v7  ;;  %155 = vmatpush.msra.mxu1 %v146_v11  ;;  %v138_v27 = vld [vmem:[#allocation5 + $0x20] sm:$0xff]  ;;  %v96_v28 = vld [vmem:[#allocation3 + $0x8] sm:$0xff]  ;;  %v137_v29 = vld [vmem:[#allocation5 + $0x18] sm:$0xff] }
  0x1c   :  { %v95_v30 = vld [vmem:[#allocation3] sm:$0xff]  ;;  %v94_v31 = vld [vmem:[#allocation2] sm:$0xff]  ;;  %v136_v32 = vld [vmem:[#allocation5 + $0x10] sm:$0xff] }
  0x1d   :  { %118 = vmatpush.msra.mxu0 %v105_v10  ;;  %156 = vmatpush.msra.mxu1 %v145_v13  ;;  %v135_v33 = vld [vmem:[#allocation5 + $0x8] sm:$0xff]  ;;  %v134_v34 = vld [vmem:[#allocation5] sm:$0xff]  ;;  %v187_v36 = vld [vmem:[#allocation8 + $0x70] sm:$0xff] }
  0x1e   :  { %v188_v35 = vld [vmem:[#allocation8 + $0x78] sm:$0xff]  ;;  %v186_v37 = vld [vmem:[#allocation8 + $0x68] sm:$0xff]  ;;  %v185_v38 = vld [vmem:[#allocation8 + $0x60] sm:$0xff] }
  0x1f   :  { %119 = vmatpush.msra.mxu0 %v104_v12  ;;  %157 = vmatpush.msra.mxu1 %v144_v15  ;;  %v184_v39 = vld [vmem:[#allocation8 + $0x58] sm:$0xff]  ;;  %v183_v40 = vld [vmem:[#allocation8 + $0x50] sm:$0xff]  ;;  %v182_v41 = vld [vmem:[#allocation8 + $0x48] sm:$0xff] }
  0x20   :  { %191 = vmatpush.msra.mxu2 %v188_v35  ;;  %v181_v42 = vld [vmem:[#allocation8 + $0x40] sm:$0xff]  ;;  %v180_v43 = vld [vmem:[#allocation8 + $0x38] sm:$0xff]  ;;  %v179_v44 = vld [vmem:[#allocation8 + $0x30] sm:$0xff] }
  0x21   :  { %120 = vmatpush.msra.mxu0 %v103_v14  ;;  %158 = vmatpush.msra.mxu1 %v143_v17  ;;  %v178_v45 = vld [vmem:[#allocation8 + $0x28] sm:$0xff]  ;;  %v177_v46 = vld [vmem:[#allocation8 + $0x20] sm:$0xff]  ;;  %v111_v47 = vld [vmem:[%s466_s2] sm:$0xff] }
  0x22   :  { %192 = vmatpush.msra.mxu2 %v187_v36  ;;  %v176_v48 = vld [vmem:[#allocation8 + $0x18] sm:$0xff]  ;;  %v112_v49 = vperm.slane %v111_v47, 0  ;;  %v175_v53 = vld [vmem:[#allocation8 + $0x10] sm:$0xff]  ;;  %v174_v54 = vld [vmem:[#allocation8 + $0x8] sm:$0xff] }
  0x23   :  { %121 = vmatpush.msra.mxu0 %v102_v16  ;;  %159 = vmatpush.msra.mxu1 %v142_v19  ;;  %v173_v55 = vld [vmem:[#allocation8] sm:$0xff]  ;;  %v150_v56 = vld [vmem:[#allocation7] sm:$0xff]  ;;  %v189_v62 = vld [vmem:[%s470_s6] sm:$0xff] }
  0x24   :  { %193 = vmatpush.msra.mxu2 %v186_v37  ;;  %v151_v57 = vperm.slane %v150_v56, 0  ;;  %v190_v0 = vperm.slane %v189_v62, 0 }
  0x25   :  { %122 = vmatpush.msra.mxu0 %v101_v18  ;;  %160 = vmatpush.msra.mxu1 %v141_v21 }
  0x26   :  { %194 = vmatpush.msra.mxu2 %v185_v38 }
  0x27   :  { %123 = vmatpush.msra.mxu0 %v100_v20  ;;  %161 = vmatpush.msra.mxu1 %v140_v23 }
  0x28   :  { %195 = vmatpush.msra.mxu2 %v184_v39 }
  0x29   :  { %124 = vmatpush.msra.mxu0 %v99_v22  ;;  %162 = vmatpush.msra.mxu1 %v139_v25 }
  0x2a   :  { %196 = vmatpush.msra.mxu2 %v183_v40 }
  0x2b   :  { %125 = vmatpush.msra.mxu0 %v98_v24  ;;  %163 = vmatpush.msra.mxu1 %v138_v27 }
  0x2c   :  { %197 = vmatpush.msra.mxu2 %v182_v41 }
  0x2d   :  { %126 = vmatpush.msra.mxu0 %v97_v26  ;;  %164 = vmatpush.msra.mxu1 %v137_v29 }
  0x2e   :  { %198 = vmatpush.msra.mxu2 %v181_v42 }
  0x2f   :  { %127 = vmatpush.msra.mxu0 %v96_v28  ;;  %165 = vmatpush.msra.mxu1 %v136_v32 }
  0x30   :  { %199 = vmatpush.msra.mxu2 %v180_v43 }
  0x31   :  { %128 = vmatpush.msra.mxu0 %v95_v30  ;;  %166 = vmatpush.msra.mxu1 %v135_v33 }
  0x32   :  { %129 = vmatmul.f32.vlgmr.msra.gmra.mxu0 %v94_v31  ;;  %200 = vmatpush.msra.mxu2 %v179_v44 }
  0x33   :  { %167 = vmatpush.msra.mxu1 %v134_v34 }
  0x34   :  { %201 = vmatpush.msra.mxu2 %v178_v45 }
  0x36   :  { %202 = vmatpush.msra.mxu2 %v177_v46 }
  0x38   :  { %203 = vmatpush.msra.mxu2 %v176_v48 }
  0x3a   :  { %204 = vmatpush.msra.mxu2 %v175_v53 }
  0x3c   :  { %205 = vmatpush.msra.mxu2 %v174_v54 }
  0x3e   :  { %206 = vmatpush.msra.mxu2 %v173_v55 }
  0xaf   :  { %v130_v50 = vpop.f32.mrf.mxu0 }
  0xb0   :  { %v131_v51 = vadd.f32 %v130_v50, %v112_v49 }
  0xb2   :  { %v133_v52 = vmax.f32 %v131_v51, 0.0 }
  0xb4   :  { %168 = vmatmul.f32.vlgmr.msra.gmra.mxu1 %v133_v52 }
 0x131   :  { %v169_v58 = vpop.f32.mrf.mxu1 }
 0x132   :  { %v170_v59 = vadd.f32 %v169_v58, %v151_v57 }
 0x134   :  { %v172_v60 = vmax.f32 %v170_v59, 0.0 }
 0x136   :  { %207 = vmatmul.f32.vlgmr.msra.gmra.mxu2 %v172_v60 }
 0x1b9   :  { %v208_v1 = vpop.f32.mrf.mxu2 }
 0x1ba   :  { %v209_v2 = vadd.f32 %v208_v1, %v190_v0 }
 0x1bc   :  { %241 = vst.msk [vmem:[%s471_s7] sm:$0xff] %vm240_vm1, %v209_v2  ;;  %v214_v3 = vsel %vm213_vm2, %v209_v2, -1e+30 }
 0x1bd   :  { %215 = vmax.xlane.f32.xlu0 %v214_v3 }
 0x230   :  { %v216_v4 = vpop.xlane.xlu0 %215 }
 0x231   :  { %v217_v5 = vsub.f32 %v214_v3, %v216_v4 }
 0x233   :  { %v218_v6 = vmul.f32 1.442695, %v217_v5 }
 0x235   :  { %266 = vpow2.f32 %v218_v6 }
 0x23b   :  { %v267_v7 = vpop.eup %266 }
 0x23c   :  { %220 = vadd.xlane.f32.xlu0 %v267_v7 }
 0x2af   :  { %v221_v8 = vpop.xlane.xlu0 %220 }
 0x2b0   :  { %268 = vrcp.f32 %v221_v8  ;;  %v233_v14 = vand.u32 2147483648, %v221_v8  ;;  %v231_v17 = vand.u32 2147483647, %v221_v8  ;;  %vm227_vm4 = vweird.f32 %v221_v8 }
 0x2b1   :  { %270 = vlog2.f32 %v221_v8 }
 0x2b2   :  { %v234_v19 = vor.u32 1.1754944e-38, %v233_v14  ;;  %vm232_vm6 = vcmp.eq.f32.partialorder %v231_v17, 8.507059e+37 }
 0x2b6   :  { %v269_v9 = vpop.eup %268 }
 0x2b7   :  { %v271_v10 = vpop.eup %270  ;;  %v223_v11 = vmul.f32 %v269_v9, %v221_v8  ;;  %vm228_vm3 = vweird.f32 %v269_v9 }
 0x2b8   :  { %v238_v12 = vmul.f32 0.6931472, %v271_v10  ;;  %vm229_vm5 = vmor %vm227_vm4, %vm228_vm3 }
 0x2b9   :  { %v224_v13 = vsub.f32 1.0, %v223_v11 }
 0x2ba   :  { %v239_v15 = vsub.f32 %v217_v5, %v238_v12 }
 0x2bb   :  { %v225_v16 = vmul.f32 %v269_v9, %v224_v13 }
 0x2bc   :  { %243 = vst.msk [vmem:[%s473_s9] sm:$0xff] %vm240_vm1, %v239_v15 }
 0x2bd   :  { %v226_v18 = vadd.f32 %v269_v9, %v225_v16 }
 0x2bf   :  { %v230_v20 = vsel %vm229_vm5, %v269_v9, %v226_v18 }
 0x2c0   :  { %v235_v21 = vsel %vm232_vm6, %v234_v19, %v230_v20 }
 0x2c1   :  { %v236_v22 = vmul.f32 %v267_v7, %v235_v21 }
 0x2c3   :  { %242 = vst.msk [vmem:[%s472_s8] sm:$0xff] %vm240_vm1, %v236_v22 }
 0x2c4   :  { %256 = vsyncpa [#allocation4], 1 }
 0x2c5   :  { %257 = vsyncpa [#allocation6], 1 }
 0x2c6   :  { %258 = vsyncpa [#allocation9], 1 }

</bundles_post_ra>
